<compile_context>
chip_gen: v6e
topology: v6e:2x2x1
jax: 0.10.0
libtpu: 0.0.40
codegen_flags: <defaults>
</compile_context>

<pallas_src>
import math

import jax
import jax.numpy as jnp
from jax.experimental import pallas as pl
from jax.experimental.pallas import tpu as pltpu


def _copy_kernel(x_ref, o_ref):
    # Pure copy of a lane/sublane-dense 2D tile; the flatten already happened
    # (for free) in the wrapper via a metadata-only reshape.  Input and output
    # are aliased, so this is an in-place identity.
    o_ref[...] = x_ref[...]


def _native_sublanes(itemsize: int) -> int:
    # Native sublane tile per dtype width: f32 -> 8, bf16 -> 16, int8/fp8 -> 32.
    return max(8, 32 // itemsize)


def flatten(x, *, tile_bytes=2 * 1024 * 1024):
    """Pallas equivalent of Flatten.forward: x.view(-1, prod(x.shape[1:]))."""
    n = x.shape[0]
    flat = math.prod(x.shape[1:])
    total = n * flat
    itemsize = jnp.dtype(x.dtype).itemsize
    nsub = _native_sublanes(itemsize)

    vmem_params = pltpu.CompilerParams(
        dimension_semantics=("parallel",),
        vmem_limit_bytes=32 * 1024 * 1024,
    )

    # ---- preferred path: lane/sublane-dense 2D slab over the whole buffer ----
    # The buffer is one contiguous byte range, so any 2D shape with the same
    # number of elements is a metadata-only reshape.  Pick (R, L) with L a
    # multiple of 128 (unmasked vld/vst) and R >= native sublane count.
    slab = None
    if total % 128 == 0:
        for L in (1024, 512, 256, 128):
            if total % L == 0 and (total // L) >= nsub:
                slab = (total // L, L)
                break
        if slab is None:  # tiny array: widest lane dim that divides total
            for L in (1024, 512, 256, 128):
                if total % L == 0:
                    slab = (total // L, L)
                    break

    if slab is not None:
        R, L = slab
        x2 = jnp.reshape(x, (R, L))
        # Sublane tile from a VMEM byte budget, in multiples of the native
        # sublane count so stores are dense full-vreg (no masked vst).
        budget_rows = max(nsub, (tile_bytes // (L * itemsize)) // nsub * nsub)
        tile_r = R if R <= nsub else min(R // nsub * nsub, budget_rows)
        grid = (pl.cdiv(R, tile_r),)
        out2 = pl.pallas_call(
            _copy_kernel,
            out_shape=jax.ShapeDtypeStruct((R, L), x.dtype),
            grid=grid,
            in_specs=[pl.BlockSpec((tile_r, L), lambda i: (i, 0))],
            out_specs=pl.BlockSpec((tile_r, L), lambda i: (i, 0)),
            input_output_aliases={0: 0},
            compiler_params=vmem_params,
        )(x2)
        return jnp.reshape(out2, (n, flat))

    # ---- fallback: total not a multiple of 128 ----
    # Tile the natural (n, flat) shape with a capped multiple-of-128 lane tile;
    # the last block along flat is a masked partial tile, keeping VMEM bounded
    # even for large, awkward feature-map sizes.
    x2 = jnp.reshape(x, (n, flat))
    if flat >= 128:
        cap = max(128, (tile_bytes // (nsub * itemsize)) // 128 * 128)
        tile_f = min(flat // 128 * 128, cap)
    else:
        tile_f = flat  # full extent (always legal)
    if n <= nsub:
        rows = n  # full extent (always legal)
    else:
        budget_rows = max(nsub, (tile_bytes // (tile_f * itemsize)) // nsub * nsub)
        rows = min(n // nsub * nsub, budget_rows)
    grid = (pl.cdiv(n, rows), pl.cdiv(flat, tile_f))
    out2 = pl.pallas_call(
        _copy_kernel,
        out_shape=jax.ShapeDtypeStruct((n, flat), x.dtype),
        grid=grid,
        in_specs=[pl.BlockSpec((rows, tile_f), lambda i, j: (i, j))],
        out_specs=pl.BlockSpec((rows, tile_f), lambda i, j: (i, j)),
        input_output_aliases={0: 0},
        compiler_params=pltpu.CompilerParams(
            dimension_semantics=("parallel", "parallel"),
            vmem_limit_bytes=32 * 1024 * 1024,
        ),
    )(x2)
    return out2


if __name__ == "__main__":
    key = jax.random.PRNGKey(0)
    x = jax.random.normal(key, (2, 4, 16, 16), dtype=jnp.float32)

    out = flatten(x)
    jax.block_until_ready(out)

    ref = jnp.reshape(x, (x.shape[0], -1))
    assert out.shape == (2, 4 * 16 * 16), out.shape
    assert out.dtype == x.dtype
    assert bool(jnp.array_equal(out, ref)), "mismatch vs reference reshape"
    print("KERNEL_OK")
</pallas_src>

<mosaic_0001>
module attributes {stable_mosaic.version = 11 : i64} {
  func.func @_copy_kernel(%arg0: i32, %arg1: memref<8x256xf32, #tpu.memory_space<vmem>>, %arg2: memref<8x256xf32, #tpu.memory_space<vmem>>) attributes {dimension_semantics = [#tpu.dimension_semantics<parallel>], iteration_bounds = array<i64: 1>, scalar_prefetch = 0 : i64, scratch_operands = 0 : i64, tpu.core_type = #tpu.core_type<tc>, window_params = [{transform_indices = @transform_0, window_bounds = array<i64: 8, 256>}, {transform_indices = @transform_1, window_bounds = array<i64: 8, 256>}]} {
    %c0 = arith.constant 0 : index
    %c0_0 = arith.constant 0 : index
    %0 = vector.load %arg1[%c0, %c0_0] : memref<8x256xf32, #tpu.memory_space<vmem>>, vector<8x256xf32>
    %c0_1 = arith.constant 0 : index
    %c0_2 = arith.constant 0 : index
    %1 = vector.load %arg2[%c0_1, %c0_2] : memref<8x256xf32, #tpu.memory_space<vmem>>, vector<8x256xf32>
    tpu.vector_store %arg2[%c0_1, %c0_2], %0 {strides = array<i32>} : memref<8x256xf32, #tpu.memory_space<vmem>>, vector<8x256xf32>,
    return
  }
  func.func @transform_0(%arg0: i32) -> (i32, i32) {
    %c0_i32 = arith.constant 0 : i32
    %c0_i32_0 = arith.constant 0 : i32
    return %arg0, %c0_i32 : i32, i32
  }
  func.func @transform_1(%arg0: i32) -> (i32, i32) {
    %c0_i32 = arith.constant 0 : i32
    %c0_i32_0 = arith.constant 0 : i32
    return %arg0, %c0_i32 : i32, i32
  }
}

</mosaic_0001>

<bundles_post_ra>
// kernel: tpu_custom_call.1
= control target key start
LH: loop header
LB: loop body
LE: loop exit
PB: predicated region body
PF: predicated region fallthrough
CT: control target
= control target key end

     0   :  { %6 = vsyncpa [#allocation3], 0  ;;  %s104_s0 = inlined_call_operand.hbm [shape: f32[8,256], index: 0, kind: input, shape index: {}, may-alias: {0,1}]   ;;  %s105_s1 = inlined_call_operand.hbm [shape: f32[8,256], index: 1, kind: output, shape index: {}, may-alias: {0,1}]  }
   0x1   :  { %7 = vsyncpa [#allocation4], 0  ;;  %s86_s6 = smov [#allocation2]  }
   0x2   :  { %s14_s7 = sshll.u32 %s86_s6, 4  ;;  %s15_s7 = int_to_ptr.vmem [resolvable:$true] %s14_s7 }
   0x3   :  { %s50_s8 = scalar_lea.vmem %s15_s7, 256  ;;  %p55_p1 = scmp.lt.s32.totalorder %s15_s7, %s15_s7 }
   0x4   :  { %p51_p0 = scmp.ne.s32.totalorder %s15_s7, %s50_s8  ;;  %p56_p2 = scmp.lt.s32.totalorder %s50_s8, %s50_s8 }
   0x6   :  { %p57_p3 = por %p56_p2, %p55_p1 }
   0x8   :  { %p58_p4 = pnand %p57_p3, %p51_p0 }
   0xa   :  { %61 = shalt.err (!%p58_p4)
}
   0xb   :  { %17 = dma.hbm_to_vmem [thread:$0]  %s104_s0, 256, %s15_s7, [#allocation3]  }
   0xc   :  { %82 = dma.done.wait [#allocation3], 256  }
   0xd   :  { %83 = vsyncadd [#allocation3], 4294967040  ;;  %s87_s11 = smov [#allocation5]   ;;  %v21_v0 = vld [vmem:[#allocation2] sm:$0xff]  ;;  %v22_v1 = vld [vmem:[#allocation2 + $0x8] sm:$0xff] }
   0xe   :  { %s31_s12 = sshll.u32 %s87_s11, 4  ;;  %23 = vst [vmem:[#allocation5] sm:$0xff] %v21_v0  ;;  %24 = vst [vmem:[#allocation5 + $0x8] sm:$0xff] %v22_v1  ;;  %s32_s12 = int_to_ptr.vmem [resolvable:$true] %s31_s12 }
   0xf   :  { %s62_s13 = scalar_lea.vmem %s32_s12, 256  ;;  %p67_p6 = scmp.lt.s32.totalorder %s32_s12, %s32_s12 }
  0x10   :  { %p63_p5 = scmp.ne.s32.totalorder %s32_s12, %s62_s13  ;;  %p68_p7 = scmp.lt.s32.totalorder %s62_s13, %s62_s13 }
  0x12   :  { %p69_p8 = por %p68_p7, %p67_p6 }
  0x14   :  { %p70_p9 = pnand %p69_p8, %p63_p5 }
  0x16   :  { %73 = shalt.err (!%p70_p9)
}
  0x17   :  { %34 = dma.vmem_to_hbm [thread:$0]  %s32_s12, 256, %s105_s1, [#allocation4]  }
  0x18   :  { %84 = dma.done.wait [#allocation4], 256  }
  0x19   :  { %85 = vsyncadd [#allocation4], 4294967040 }
  0x1a   :  { %38 = vsyncpa [#allocation3], 1 }
  0x1b   :  { %39 = vsyncpa [#allocation4], 1 }

</bundles_post_ra>
